<compile_context>
chip_gen: v6e
topology: v6e:2x2x1
jax: 0.10.0
libtpu: 0.0.40
codegen_flags: <defaults>
</compile_context>

<pallas_src>
import functools

import numpy as np
import jax
import jax.numpy as jnp
from jax import lax
from jax.experimental import pallas as pl
from jax.experimental.pallas import tpu as pltpu

# ----------------------------- model constants ------------------------------
INPUT_SIZE = 102
HIDDEN1 = 32
HIDDEN2 = 32          # script sets hidden_size2 = args.hidden_size1
NUM_OUT = 2
BN_EPS = 1e-5

# ----------------------------- TPU layout knobs ------------------------------
FPAD = 128                 # lane-dense padded width for hidden/output features
OUT_ROWS = 8               # sublane-padded row count of the transposed output
DOT_DTYPE = jnp.bfloat16   # MXU operand dtype (f32 accumulation)
TILE_ROWS = 1024           # batch tile rows for the two-pass (large batch) path


def _vmem_capacity_bytes():
    try:
        return int(pltpu.get_tpu_info().vmem_capacity_bytes)
    except Exception:
        return 64 << 20    # conservative (v7x-sized) fallback

_VMEM_CAP = _vmem_capacity_bytes()
_BIG_VMEM = _VMEM_CAP >= (100 << 20)          # v5e/v6e: 128 MiB, v7x: 64 MiB
FUSED_MAX_ROWS = 8192 if _BIG_VMEM else 4096  # fused single-call threshold
_FUSED_VMEM_LIMIT = (96 << 20) if _BIG_VMEM else (48 << 20)
_TILED_VMEM_LIMIT = (64 << 20) if _BIG_VMEM else (40 << 20)


def _pad2(a, rows, cols):
    r, c = a.shape
    return jnp.pad(a, ((0, rows - r), (0, cols - c)))


# ------------------------- fused single-block kernel -------------------------
def _fused_kernel(x_ref, w1_ref, b1_ref, w2_ref, b2_ref, w3t_ref, b3c_ref,
                  o_ref, *, n_valid):
    """Whole batch resident in VMEM; BN batch stats computed in-kernel.
    x_ref: (B, 102) f32 (unpadded).  Output o_ref: (8, B) f32 (transposed)."""
    x = x_ref[...]
    inv_n = 1.0 / float(n_valid)

    def bn(a):                                  # f32 stats, biased variance
        mean = jnp.sum(a, axis=0, keepdims=True) * inv_n
        var = jnp.maximum(
            jnp.sum(a * a, axis=0, keepdims=True) * inv_n - mean * mean, 0.0)
        return (a - mean) * lax.rsqrt(var + BN_EPS)

    h1 = jnp.dot(bn(x).astype(DOT_DTYPE), w1_ref[...],
                 preferred_element_type=jnp.float32) + b1_ref[...]
    h1n = jnp.maximum(bn(h1), 0.0).astype(DOT_DTYPE)
    h2 = jnp.dot(h1n, w2_ref[...],
                 preferred_element_type=jnp.float32) + b2_ref[...]
    h2n = jnp.maximum(bn(h2), 0.0).astype(DOT_DTYPE)
    # last layer produced transposed: (8, B) = W3^T @ h2n^T  (lane-dense output)
    o_t = lax.dot_general(w3t_ref[...], h2n, (((1,), (1,)), ((), ())),
                          preferred_element_type=jnp.float32)
    o_ref[...] = o_t + b3c_ref[...]


# ---------------------- two-pass path, pass 1: statistics --------------------
def _bn_stats_kernel(x_ref, w1_ref, b1_ref, w2_ref, b2_ref, stats_ref,
                     sum_x_sc, ssq_x_sc, gram_sc, sum_h2_sc, ssq_h2_sc,
                     *, n_valid, tile_rows, need_mask):
    """grid = (2 phases, batch tiles).
    Phase 0: accumulate sum(x), sumsq(x), Gram(x); finalize mean/inv_std for x
             AND (analytically, since h1 is affine in x) for h1.
    Phase 1: accumulate sum/sumsq of h2 (ReLU is nonlinear); finalize h2 stats.
    Stats live in the resident output block (constant index map) and are
    written back to HBM once at grid end.
    Stats rows: 0 mean_x, 1 inv_std_x, 2 mean_h1, 3 inv_std_h1,
                4 mean_h2, 5 inv_std_h2."""
    p = pl.program_id(0)
    t = pl.program_id(1)
    nt = pl.num_programs(1)
    inv_n = 1.0 / float(n_valid)

    @pl.when(jnp.logical_and(p == 0, t == 0))
    def _():
        stats_ref[...] = jnp.zeros_like(stats_ref)
        sum_x_sc[...] = jnp.zeros_like(sum_x_sc)
        ssq_x_sc[...] = jnp.zeros_like(ssq_x_sc)
        gram_sc[...] = jnp.zeros_like(gram_sc)

    @pl.when(jnp.logical_and(p == 1, t == 0))
    def _():
        sum_h2_sc[...] = jnp.zeros_like(sum_h2_sc)
        ssq_h2_sc[...] = jnp.zeros_like(ssq_h2_sc)

    x = x_ref[...]                                      # (tile_rows, 102) f32

    if need_mask:
        row = t * tile_rows + lax.broadcasted_iota(jnp.int32, (tile_rows, 1), 0)
        valid = row < n_valid
    else:
        valid = None

    def maskv(a):                                       # NaN-safe row masking
        return a if valid is None else jnp.where(valid, a, 0.0)

    def dense(a_bf16, w_ref, b_ref):
        return jnp.dot(a_bf16, w_ref[...],
                       preferred_element_type=jnp.float32) + b_ref[...]

    # ---- phase 0: raw-x moments + Gram matrix -------------------------------
    @pl.when(p == 0)
    def _():
        xm = maskv(x)
        sum_x_sc[...] += jnp.sum(xm, axis=0, keepdims=True)
        ssq_x_sc[...] += jnp.sum(xm * xm, axis=0, keepdims=True)
        xb = xm.astype(DOT_DTYPE)
        gram_sc[...] += lax.dot_general(                 # x^T x  (102, 102)
            xb, xb, (((0,), (0,)), ((), ())),
            preferred_element_type=jnp.float32)

    # ---- phase 1: h2 moments (uses x/h1 stats finalized in phase 0) ---------
    @pl.when(p == 1)
    def _():
        mean_x = stats_ref[0:1, 0:INPUT_SIZE]
        inv_x = stats_ref[1:2, 0:INPUT_SIZE]
        xn = ((x - mean_x) * inv_x).astype(DOT_DTYPE)
        h1 = dense(xn, w1_ref, b1_ref)
        h1n = jnp.maximum((h1 - stats_ref[2:3, :]) * stats_ref[3:4, :], 0.0)
        h2 = dense(h1n.astype(DOT_DTYPE), w2_ref, b2_ref)
        h2m = maskv(h2)
        sum_h2_sc[...] += jnp.sum(h2m, axis=0, keepdims=True)
        ssq_h2_sc[...] += jnp.sum(h2m * h2m, axis=0, keepdims=True)

    # ---- finalize phase 0: x stats + analytic h1 stats -----------------------
    @pl.when(jnp.logical_and(p == 0, t == nt - 1))
    def _():
        mean_x = sum_x_sc[...] * inv_n                               # (1, 102)
        var_x = jnp.maximum(ssq_x_sc[...] * inv_n - mean_x * mean_x, 0.0)
        inv_x = lax.rsqrt(var_x + BN_EPS)
        stats_ref[0:1, 0:INPUT_SIZE] = mean_x
        stats_ref[1:2, 0:INPUT_SIZE] = inv_x

        # h1 = BN(x) @ W1 + b1 is affine in x:
        #   mean(h1) = b1 (BN output has exact zero batch mean)
        #   var(h1)  = diag(W1s^T Cov(x) W1s), W1s = diag(inv_std_x) @ W1
        w1f = w1_ref[...].astype(jnp.float32)                        # (102, 128)
        ri = lax.broadcasted_iota(jnp.int32, (INPUT_SIZE, INPUT_SIZE), 0)
        ci = lax.broadcasted_iota(jnp.int32, (INPUT_SIZE, INPUT_SIZE), 1)
        dmat = jnp.where(ri == ci, inv_x, 0.0)                       # diag(inv)
        w1s = jnp.dot(dmat, w1f, preferred_element_type=jnp.float32)
        a_m = jnp.dot(gram_sc[...], w1s,
                      preferred_element_type=jnp.float32) * inv_n    # (102,128)
        t1 = jnp.sum(w1s * a_m, axis=0, keepdims=True)               # (1, 128)
        m8 = jnp.broadcast_to(mean_x, (8, INPUT_SIZE))
        v = jnp.dot(m8, w1s, preferred_element_type=jnp.float32)[0:1, :]
        var_h1 = jnp.maximum(t1 - v * v, 0.0)
        stats_ref[2:3, :] = b1_ref[...]
        stats_ref[3:4, :] = lax.rsqrt(var_h1 + BN_EPS)

    # ---- finalize phase 1: h2 stats ------------------------------------------
    @pl.when(jnp.logical_and(p == 1, t == nt - 1))
    def _():
        mean_h2 = sum_h2_sc[...] * inv_n
        var_h2 = jnp.maximum(ssq_h2_sc[...] * inv_n - mean_h2 * mean_h2, 0.0)
        stats_ref[4:5, :] = mean_h2
        stats_ref[5:6, :] = lax.rsqrt(var_h2 + BN_EPS)


# -------------------- two-pass path, pass 2: normalize + matmuls -------------
def _apply_kernel(stats_ref, x_ref, w1_ref, b1_ref, w2_ref, b2_ref, w3t_ref,
                  b3c_ref, o_ref):
    """Independent per batch tile ('parallel' grid axis -> megacore).
    Output is the transposed lane-dense (8, tile_rows) logits slab."""
    def dense(a_bf16, w_ref, b_ref):
        return jnp.dot(a_bf16, w_ref[...],
                       preferred_element_type=jnp.float32) + b_ref[...]

    x = x_ref[...]
    xn = ((x - stats_ref[0:1, 0:INPUT_SIZE]) *
          stats_ref[1:2, 0:INPUT_SIZE]).astype(DOT_DTYPE)
    h1 = dense(xn, w1_ref, b1_ref)
    h1n = jnp.maximum((h1 - stats_ref[2:3, :]) * stats_ref[3:4, :],
                      0.0).astype(DOT_DTYPE)
    h2 = dense(h1n, w2_ref, b2_ref)
    h2n = jnp.maximum((h2 - stats_ref[4:5, :]) * stats_ref[5:6, :],
                      0.0).astype(DOT_DTYPE)
    o_t = lax.dot_general(w3t_ref[...], h2n, (((1,), (1,)), ((), ())),
                          preferred_element_type=jnp.float32)        # (8, tb)
    o_ref[...] = o_t + b3c_ref[...]


# --------------------------------- wrapper -----------------------------------
@functools.partial(jax.jit, static_argnames=("force_two_pass",))
def neuralnet_forward(x, params, force_two_pass=False):
    w1, b1, w2, b2, w3, b3 = params           # weights (in, out), biases (1, out)
    B, F = x.shape
    assert F == INPUT_SIZE
    assert B > 1, "training-mode BatchNorm1d requires batch > 1"

    x = x.astype(jnp.float32)                 # no HBM padding of x (kernels take (B, 102))
    w1_p = _pad2(w1, INPUT_SIZE, FPAD).astype(DOT_DTYPE)   # (102, 128)
    w2_p = _pad2(w2, FPAD, FPAD).astype(DOT_DTYPE)         # (128, 128)
    w3t_p = _pad2(w3.T, OUT_ROWS, FPAD).astype(DOT_DTYPE)  # (8, 128) pre-transposed
    b1_p = _pad2(b1, 1, FPAD)                              # (1, 128)
    b2_p = _pad2(b2, 1, FPAD)
    b3c_p = _pad2(b3.T, OUT_ROWS, 1)                       # (8, 1) column bias

    use_fused = (not force_two_pass) and (B <= FUSED_MAX_ROWS)

    if use_fused:
        vmem = pl.BlockSpec(memory_space=pltpu.MemorySpace.VMEM)
        out_t = pl.pallas_call(
            functools.partial(_fused_kernel, n_valid=B),
            out_shape=jax.ShapeDtypeStruct((OUT_ROWS, B), jnp.float32),
            in_specs=[vmem] * 7,
            out_specs=vmem,
            compiler_params=pltpu.CompilerParams(
                vmem_limit_bytes=_FUSED_VMEM_LIMIT),
        )(x, w1_p, b1_p, w2_p, b2_p, w3t_p, b3c_p)
        return out_t[:NUM_OUT, :].T

    tb = TILE_ROWS
    nt = (B + tb - 1) // tb

    def rep2(shape):      # resident block (fetched once), 2-D grid
        return pl.BlockSpec(shape, lambda p, t: (0, 0))

    def rep1(shape):      # resident block, 1-D grid
        return pl.BlockSpec(shape, lambda t: (0, 0))

    # ---- pass 1: BN statistics (x streamed twice) ----------------------------
    stats = pl.pallas_call(
        functools.partial(_bn_stats_kernel, n_valid=B, tile_rows=tb,
                          need_mask=(B % tb != 0)),
        out_shape=jax.ShapeDtypeStruct((8, FPAD), jnp.float32),
        grid_spec=pltpu.PrefetchScalarGridSpec(
            num_scalar_prefetch=0,
            grid=(2, nt),
            in_specs=[
                pl.BlockSpec((tb, INPUT_SIZE), lambda p, t: (t, 0)),
                rep2((INPUT_SIZE, FPAD)), rep2((1, FPAD)),
                rep2((FPAD, FPAD)), rep2((1, FPAD)),
            ],
            out_specs=rep2((8, FPAD)),
            scratch_shapes=[
                pltpu.VMEM((1, INPUT_SIZE), jnp.float32),       # sum(x)
                pltpu.VMEM((1, INPUT_SIZE), jnp.float32),       # sumsq(x)
                pltpu.VMEM((INPUT_SIZE, INPUT_SIZE), jnp.float32),  # Gram(x)
                pltpu.VMEM((1, FPAD), jnp.float32),             # sum(h2)
                pltpu.VMEM((1, FPAD), jnp.float32),             # sumsq(h2)
            ]),
        compiler_params=pltpu.CompilerParams(
            dimension_semantics=("arbitrary", "arbitrary"),
            vmem_limit_bytes=_TILED_VMEM_LIMIT),
    )(x, w1_p, b1_p, w2_p, b2_p)

    # ---- pass 2: normalize + matmuls (x streamed once, compact output) -------
    out_t = pl.pallas_call(
        _apply_kernel,
        out_shape=jax.ShapeDtypeStruct((OUT_ROWS, B), jnp.float32),
        grid_spec=pltpu.PrefetchScalarGridSpec(
            num_scalar_prefetch=0,
            grid=(nt,),
            in_specs=[
                rep1((8, FPAD)),
                pl.BlockSpec((tb, INPUT_SIZE), lambda t: (t, 0)),
                rep1((INPUT_SIZE, FPAD)), rep1((1, FPAD)),
                rep1((FPAD, FPAD)), rep1((1, FPAD)),
                rep1((OUT_ROWS, FPAD)), rep1((OUT_ROWS, 1)),
            ],
            out_specs=pl.BlockSpec((OUT_ROWS, tb), lambda t: (0, t)),
        ),
        compiler_params=pltpu.CompilerParams(
            dimension_semantics=("parallel",),
            vmem_limit_bytes=_TILED_VMEM_LIMIT),
    )(stats, x, w1_p, b1_p, w2_p, b2_p, w3t_p, b3c_p)

    return out_t[:NUM_OUT, :].T


# ------------------------------ init & reference -----------------------------
def xavier_uniform(key, fan_in, fan_out):
    limit = (6.0 / (fan_in + fan_out)) ** 0.5
    return jax.random.uniform(key, (fan_in, fan_out), jnp.float32, -limit, limit)


def linear_bias(key, fan_in, fan_out):
    bound = 1.0 / (fan_in ** 0.5)
    return jax.random.uniform(key, (1, fan_out), jnp.float32, -bound, bound)


def init_params(key):
    k1, k2, k3, k4, k5, k6 = jax.random.split(key, 6)
    w1 = xavier_uniform(k1, INPUT_SIZE, HIDDEN1)
    b1 = linear_bias(k2, INPUT_SIZE, HIDDEN1)
    w2 = xavier_uniform(k3, HIDDEN1, HIDDEN2)
    b2 = linear_bias(k4, HIDDEN1, HIDDEN2)
    w3 = xavier_uniform(k5, HIDDEN2, NUM_OUT)
    b3 = linear_bias(k6, HIDDEN2, NUM_OUT)
    return w1, b1, w2, b2, w3, b3


def _reference_forward(x, params):
    """Pure-JAX reference with matching numerics (bf16 MXU operands, f32 BN)."""
    w1, b1, w2, b2, w3, b3 = params

    def bn(a):
        mean = jnp.mean(a, axis=0, keepdims=True)
        var = jnp.mean(a * a, axis=0, keepdims=True) - mean * mean
        return (a - mean) * lax.rsqrt(var + BN_EPS)

    def dense(a, w, b):
        return jnp.dot(a.astype(DOT_DTYPE), w.astype(DOT_DTYPE),
                       preferred_element_type=jnp.float32) + b

    h = dense(bn(x), w1, b1)
    h = dense(jnp.maximum(bn(h), 0.0), w2, b2)
    return dense(jnp.maximum(bn(h), 0.0), w3, b3)


if __name__ == "__main__":
    key = jax.random.PRNGKey(0)
    k_small, k_big, k_p = jax.random.split(key, 3)
    params = init_params(k_p)

    # Small batch: single fused pallas_call (x read from HBM exactly once).
    x_small = jax.random.normal(k_small, (8, INPUT_SIZE), jnp.float32)
    out_small = neuralnet_forward(x_small, params)
    jax.block_until_ready(out_small)
    assert out_small.shape == (8, NUM_OUT)
    np.testing.assert_allclose(np.asarray(out_small),
                               np.asarray(_reference_forward(x_small, params)),
                               rtol=1e-2, atol=1e-2)

    # Moderate batch forced through the two-pass (Gram-stats + apply) path:
    # 2 full 1024-row tiles + 1 ragged tile, exercising masking and the
    # analytic h1 statistics.
    x_big = jax.random.normal(k_big, (2 * TILE_ROWS + 300, INPUT_SIZE),
                              jnp.float32)
    out_big = neuralnet_forward(x_big, params, force_two_pass=True)
    jax.block_until_ready(out_big)
    assert out_big.shape == (x_big.shape[0], NUM_OUT)
    np.testing.assert_allclose(np.asarray(out_big),
                               np.asarray(_reference_forward(x_big, params)),
                               rtol=1e-2, atol=1e-2)

    print("KERNEL_OK")
</pallas_src>

<mosaic_0001>
module attributes {stable_mosaic.version = 11 : i64} {
  func.func @_fused_kernel(%arg0: memref<8x102xf32, #tpu.memory_space<vmem>>, %arg1: memref<102x128xbf16, #tpu.memory_space<vmem>>, %arg2: memref<1x128xf32, #tpu.memory_space<vmem>>, %arg3: memref<128x128xbf16, #tpu.memory_space<vmem>>, %arg4: memref<1x128xf32, #tpu.memory_space<vmem>>, %arg5: memref<8x128xbf16, #tpu.memory_space<vmem>>, %arg6: memref<8x1xf32, #tpu.memory_space<vmem>>, %arg7: memref<8x8xf32, #tpu.memory_space<vmem>>) attributes {dimension_semantics = [], scalar_prefetch = 0 : i64, scratch_operands = 0 : i64, tpu.core_type = #tpu.core_type<tc>} {
    %c0 = arith.constant 0 : index
    %c0_0 = arith.constant 0 : index
    %0 = vector.load %arg0[%c0, %c0_0] : memref<8x102xf32, #tpu.memory_space<vmem>>, vector<8x102xf32>
    %cst = arith.constant dense<0.000000e+00> : vector<102xf32>
    %1 = vector.multi_reduction <add>, %0, %cst [0] : vector<8x102xf32> to vector<102xf32>
    %2 = vector.shape_cast %1 : vector<102xf32> to vector<1x102xf32>
    %cst_1 = arith.constant 1.250000e-01 : f32
    %3 = vector.broadcast %cst_1 : f32 to vector<1x102xf32>
    %4 = arith.mulf %2, %3 : vector<1x102xf32>
    %5 = arith.mulf %0, %0 : vector<8x102xf32>
    %cst_2 = arith.constant dense<0.000000e+00> : vector<102xf32>
    %6 = vector.multi_reduction <add>, %5, %cst_2 [0] : vector<8x102xf32> to vector<102xf32>
    %7 = vector.shape_cast %6 : vector<102xf32> to vector<1x102xf32>
    %cst_3 = arith.constant 1.250000e-01 : f32
    %8 = vector.broadcast %cst_3 : f32 to vector<1x102xf32>
    %9 = arith.mulf %7, %8 : vector<1x102xf32>
    %10 = arith.mulf %4, %4 : vector<1x102xf32>
    %11 = arith.subf %9, %10 : vector<1x102xf32>
    %cst_4 = arith.constant 0.000000e+00 : f32
    %12 = vector.broadcast %cst_4 : f32 to vector<1x102xf32>
    %13 = arith.maximumf %11, %12 : vector<1x102xf32>
    %14 = vector.broadcast %4 : vector<1x102xf32> to vector<8x102xf32>
    %15 = arith.subf %0, %14 : vector<8x102xf32>
    %cst_5 = arith.constant 9.99999974E-6 : f32
    %16 = vector.broadcast %cst_5 : f32 to vector<1x102xf32>
    %17 = arith.addf %13, %16 : vector<1x102xf32>
    %18 = math.rsqrt %17 : vector<1x102xf32>
    %19 = vector.broadcast %18 : vector<1x102xf32> to vector<8x102xf32>
    %20 = arith.mulf %15, %19 : vector<8x102xf32>
    %21 = arith.truncf %20 : vector<8x102xf32> to vector<8x102xbf16>
    %c0_6 = arith.constant 0 : index
    %c0_7 = arith.constant 0 : index
    %22 = vector.load %arg1[%c0_6, %c0_7] : memref<102x128xbf16, #tpu.memory_space<vmem>>, vector<102x128xbf16>
    %cst_8 = arith.constant dense<0.000000e+00> : vector<8x128xf32>
    %23 = tpu.matmul %21, %22, %cst_8 {dimension_numbers = #tpu.dot_dimension_numbers<[1], [0], [0], [1], [0, 0, 1, 1], [], []>} : vector<8x102xbf16>, vector<102x128xbf16>, vector<8x128xf32> -> vector<8x128xf32>
    %c0_9 = arith.constant 0 : index
    %c0_10 = arith.constant 0 : index
    %24 = vector.load %arg2[%c0_9, %c0_10] : memref<1x128xf32, #tpu.memory_space<vmem>>, vector<1x128xf32>
    %25 = vector.broadcast %24 : vector<1x128xf32> to vector<8x128xf32>
    %26 = arith.addf %23, %25 : vector<8x128xf32>
    %cst_11 = arith.constant dense<0.000000e+00> : vector<128xf32>
    %27 = vector.multi_reduction <add>, %26, %cst_11 [0] : vector<8x128xf32> to vector<128xf32>
    %28 = vector.shape_cast %27 : vector<128xf32> to vector<1x128xf32>
    %cst_12 = arith.constant 1.250000e-01 : f32
    %29 = vector.broadcast %cst_12 : f32 to vector<1x128xf32>
    %30 = arith.mulf %28, %29 : vector<1x128xf32>
    %31 = arith.mulf %26, %26 : vector<8x128xf32>
    %cst_13 = arith.constant dense<0.000000e+00> : vector<128xf32>
    %32 = vector.multi_reduction <add>, %31, %cst_13 [0] : vector<8x128xf32> to vector<128xf32>
    %33 = vector.shape_cast %32 : vector<128xf32> to vector<1x128xf32>
    %cst_14 = arith.constant 1.250000e-01 : f32
    %34 = vector.broadcast %cst_14 : f32 to vector<1x128xf32>
    %35 = arith.mulf %33, %34 : vector<1x128xf32>
    %36 = arith.mulf %30, %30 : vector<1x128xf32>
    %37 = arith.subf %35, %36 : vector<1x128xf32>
    %cst_15 = arith.constant 0.000000e+00 : f32
    %38 = vector.broadcast %cst_15 : f32 to vector<1x128xf32>
    %39 = arith.maximumf %37, %38 : vector<1x128xf32>
    %40 = vector.broadcast %30 : vector<1x128xf32> to vector<8x128xf32>
    %41 = arith.subf %26, %40 : vector<8x128xf32>
    %cst_16 = arith.constant 9.99999974E-6 : f32
    %42 = vector.broadcast %cst_16 : f32 to vector<1x128xf32>
    %43 = arith.addf %39, %42 : vector<1x128xf32>
    %44 = math.rsqrt %43 : vector<1x128xf32>
    %45 = vector.broadcast %44 : vector<1x128xf32> to vector<8x128xf32>
    %46 = arith.mulf %41, %45 : vector<8x128xf32>
    %cst_17 = arith.constant 0.000000e+00 : f32
    %47 = vector.broadcast %cst_17 : f32 to vector<8x128xf32>
    %48 = arith.maximumf %46, %47 : vector<8x128xf32>
    %49 = arith.truncf %48 : vector<8x128xf32> to vector<8x128xbf16>
    %c0_18 = arith.constant 0 : index
    %c0_19 = arith.constant 0 : index
    %50 = vector.load %arg3[%c0_18, %c0_19] : memref<128x128xbf16, #tpu.memory_space<vmem>>, vector<128x128xbf16>
    %cst_20 = arith.constant dense<0.000000e+00> : vector<8x128xf32>
    %51 = tpu.matmul %49, %50, %cst_20 {dimension_numbers = #tpu.dot_dimension_numbers<[1], [0], [0], [1], [0, 0, 1, 1], [], []>} : vector<8x128xbf16>, vector<128x128xbf16>, vector<8x128xf32> -> vector<8x128xf32>
    %c0_21 = arith.constant 0 : index
    %c0_22 = arith.constant 0 : index
    %52 = vector.load %arg4[%c0_21, %c0_22] : memref<1x128xf32, #tpu.memory_space<vmem>>, vector<1x128xf32>
    %53 = vector.broadcast %52 : vector<1x128xf32> to vector<8x128xf32>
    %54 = arith.addf %51, %53 : vector<8x128xf32>
    %cst_23 = arith.constant dense<0.000000e+00> : vector<128xf32>
    %55 = vector.multi_reduction <add>, %54, %cst_23 [0] : vector<8x128xf32> to vector<128xf32>
    %56 = vector.shape_cast %55 : vector<128xf32> to vector<1x128xf32>
    %cst_24 = arith.constant 1.250000e-01 : f32
    %57 = vector.broadcast %cst_24 : f32 to vector<1x128xf32>
    %58 = arith.mulf %56, %57 : vector<1x128xf32>
    %59 = arith.mulf %54, %54 : vector<8x128xf32>
    %cst_25 = arith.constant dense<0.000000e+00> : vector<128xf32>
    %60 = vector.multi_reduction <add>, %59, %cst_25 [0] : vector<8x128xf32> to vector<128xf32>
    %61 = vector.shape_cast %60 : vector<128xf32> to vector<1x128xf32>
    %cst_26 = arith.constant 1.250000e-01 : f32
    %62 = vector.broadcast %cst_26 : f32 to vector<1x128xf32>
    %63 = arith.mulf %61, %62 : vector<1x128xf32>
    %64 = arith.mulf %58, %58 : vector<1x128xf32>
    %65 = arith.subf %63, %64 : vector<1x128xf32>
    %cst_27 = arith.constant 0.000000e+00 : f32
    %66 = vector.broadcast %cst_27 : f32 to vector<1x128xf32>
    %67 = arith.maximumf %65, %66 : vector<1x128xf32>
    %68 = vector.broadcast %58 : vector<1x128xf32> to vector<8x128xf32>
    %69 = arith.subf %54, %68 : vector<8x128xf32>
    %cst_28 = arith.constant 9.99999974E-6 : f32
    %70 = vector.broadcast %cst_28 : f32 to vector<1x128xf32>
    %71 = arith.addf %67, %70 : vector<1x128xf32>
    %72 = math.rsqrt %71 : vector<1x128xf32>
    %73 = vector.broadcast %72 : vector<1x128xf32> to vector<8x128xf32>
    %74 = arith.mulf %69, %73 : vector<8x128xf32>
    %cst_29 = arith.constant 0.000000e+00 : f32
    %75 = vector.broadcast %cst_29 : f32 to vector<8x128xf32>
    %76 = arith.maximumf %74, %75 : vector<8x128xf32>
    %77 = arith.truncf %76 : vector<8x128xf32> to vector<8x128xbf16>
    %c0_30 = arith.constant 0 : index
    %c0_31 = arith.constant 0 : index
    %78 = vector.load %arg5[%c0_30, %c0_31] : memref<8x128xbf16, #tpu.memory_space<vmem>>, vector<8x128xbf16>
    %cst_32 = arith.constant dense<0.000000e+00> : vector<8x8xf32>
    %79 = tpu.matmul %78, %77, %cst_32 {dimension_numbers = #tpu.dot_dimension_numbers<[1], [1], [0], [0], [0, 0, 1, 0], [], []>} : vector<8x128xbf16>, vector<8x128xbf16>, vector<8x8xf32> -> vector<8x8xf32>
    %c0_33 = arith.constant 0 : index
    %c0_34 = arith.constant 0 : index
    %80 = vector.load %arg6[%c0_33, %c0_34] : memref<8x1xf32, #tpu.memory_space<vmem>>, vector<8x1xf32>
    %81 = vector.broadcast %80 : vector<8x1xf32> to vector<8x8xf32>
    %82 = arith.addf %79, %81 : vector<8x8xf32>
    %c0_35 = arith.constant 0 : index
    %c0_36 = arith.constant 0 : index
    %83 = vector.load %arg7[%c0_35, %c0_36] : memref<8x8xf32, #tpu.memory_space<vmem>>, vector<8x8xf32>
    tpu.vector_store %arg7[%c0_35, %c0_36], %82 {strides = array<i32>} : memref<8x8xf32, #tpu.memory_space<vmem>>, vector<8x8xf32>,
    return
  }
}

</mosaic_0001>

<bundles_post_ra>
// kernel: neuralnet_forward.1
= control target key start
LH: loop header
LB: loop body
LE: loop exit
PB: predicated region body
PF: predicated region fallthrough
CT: control target
= control target key end

     0   :  { %vm116_vm0 = vcmask 1042432   ;;  %v478_v0 = vmov 0.0   ;;  %vm479_vm1 = vmmov 0   ;;  %vm28_vm2 = vcmask 834560   ;;  %s609_s1 = inlined_call_operand.vmem [shape: bf16[102,128], index: 1, kind: input, shape index: {}]   ;;  %s610_s0 = inlined_call_operand.vmem [shape: f32[8,102], index: 0, kind: input, shape index: {}]   ;;  %s611_s3 = inlined_call_operand.vmem [shape: bf16[128,128], index: 3, kind: input, shape index: {}]   ;;  %s612_s2 = inlined_call_operand.vmem [shape: f32[1,128], index: 2, kind: input, shape index: {}]   ;;  %s613_s6 = inlined_call_operand.vmem [shape: f32[8,1], index: 6, kind: input, shape index: {}]   ;;  %s614_s4 = inlined_call_operand.vmem [shape: f32[1,128], index: 4, kind: input, shape index: {}]   ;;  %s615_s5 = inlined_call_operand.vmem [shape: bf16[8,128], index: 5, kind: input, shape index: {}]   ;;  %s616_s7 = inlined_call_operand.vmem [shape: f32[8,8], index: 7, kind: output, shape index: {}]  }
   0x1   :  { %409 = vmatprep.subr.bf16.mxu0 %v478_v0  ;;  %v457_v1 = vld [vmem:[%s609_s1 + $0x30] ss:$0 sps:$4 sm:$0x77]   ;;  %423 = vmatprep.mubr.msk.bf16.mxu0 %vm479_vm1, %v478_v0  ;;  %v458_v3 = vld [vmem:[%s609_s1 + $0x28] sm:$0xff]   ;;  %v27_v4 = vld [vmem:[%s610_s0] sm:$0xff]  ;;  %vm366_vm3 = vcmask 64512  }
   0x2   :  { %427 = vmatprep.subr.bf16.mxu1 %v478_v0  ;;  %443 = vmatprep.mubr.msk.bf16.mxu1 %vm479_vm1, %v478_v0  ;;  %v118_v2 = vsel %vm116_vm0, %v457_v1, 0  ;;  %v459_v5 = vld [vmem:[%s609_s1 + $0x20] sm:$0xff]   ;;  %v29_v6 = vsel %vm28_vm2, %v27_v4, 0.0  ;;  %v37_v7 = vmul.f32 %v27_v4, %v27_v4  ;;  %v460_v12 = vld [vmem:[%s609_s1 + $0x18] sm:$0xff]   ;;  %v461_v17 = vld [vmem:[%s609_s1 + $0x10] sm:$0xff]  }
   0x3   :  { %410 = vmatpush3.bf16.msra.mxu0 %v118_v2  ;;  %v30_v8 = vrot.slane %v29_v6, 4  ;;  %v462_v22 = vld [vmem:[%s609_s1 + $0x8] sm:$0xff]   ;;  %v463_v27 = vld [vmem:[%s609_s1] sm:$0xff]   ;;  %v464_v35 = vld [vmem:[%s611_s3 + $0x38] sm:$0xff]  }
   0x4   :  { %411 = vmatprep.subr.bf16.mxu0 %v478_v0  ;;  %v38_v9 = vsel %vm28_vm2, %v37_v7, 0.0  ;;  %428 = vmatpush3.bf16.msra.mxu1 %v464_v35  ;;  %v465_v36 = vld [vmem:[%s611_s3 + $0x30] sm:$0xff]   ;;  %v466_v37 = vld [vmem:[%s611_s3 + $0x28] sm:$0xff]   ;;  %v467_v38 = vld [vmem:[%s611_s3 + $0x20] sm:$0xff]  }
   0x5   :  { %v31_v10 = vadd.f32 %v30_v8, %v29_v6  ;;  %v39_v11 = vrot.slane %v38_v9, 4  ;;  %429 = vmatprep.subr.bf16.mxu1 %v478_v0  ;;  %v468_v39 = vld [vmem:[%s611_s3 + $0x18] sm:$0xff]   ;;  %v469_v40 = vld [vmem:[%s611_s3 + $0x10] sm:$0xff]   ;;  %v470_v41 = vld [vmem:[%s611_s3 + $0x8] sm:$0xff]  }
   0x6   :  { %v471_v42 = vld [vmem:[%s611_s3] sm:$0xff]  }
   0x7   :  { %412 = vmatpush3.bf16.msra.mxu0 %v458_v3  ;;  %v32_v13 = vrot.slane %v31_v10, 2  ;;  %v40_v14 = vadd.f32 %v39_v11, %v38_v9  ;;  %v372_v43 = vld [vmem:[%s612_s2] ss:$0 sm:$0xff]  ;;  %v480_v9 = vmov 0  }
   0x8   :  { %413 = vmatprep.subr.bf16.mxu0 %v478_v0  ;;  %430 = vmatpush3.bf16.msra.mxu1 %v465_v36  ;;  %v381_v11 = vld [vmem:[%s614_s4] ss:$0 sm:$0xff] }
   0x9   :  { %v33_v15 = vadd.f32 %v32_v13, %v31_v10  ;;  %v41_v16 = vrot.slane %v40_v14, 2  ;;  %431 = vmatprep.subr.bf16.mxu1 %v478_v0  ;;  %456 = vset.pattern.permute.xlu0 %v480_v9  ;;  %v320_v10 = vld [vmem:[%s613_s6] sm:$0xff] }
   0xa   :  { %323 = vperm.xlu0 %456, %v320_v10  }
   0xb   :  { %414 = vmatpush3.bf16.msra.mxu0 %v459_v5  ;;  %v34_v18 = vrot.slane %v33_v15, 1  ;;  %v42_v19 = vadd.f32 %v41_v16, %v40_v14 }
   0xc   :  { %415 = vmatprep.subr.bf16.mxu0 %v478_v0  ;;  %432 = vmatpush3.bf16.msra.mxu1 %v466_v37 }
   0xd   :  { %v35_v20 = vadd.f32 %v34_v18, %v33_v15  ;;  %v43_v21 = vrot.slane %v42_v19, 1  ;;  %433 = vmatprep.subr.bf16.mxu1 %v478_v0 }
   0xf   :  { %416 = vmatpush3.bf16.msra.mxu0 %v460_v12  ;;  %v36_v23 = vmul.f32 0.125, %v35_v20  ;;  %v44_v24 = vadd.f32 %v43_v21, %v42_v19 }
  0x10   :  { %417 = vmatprep.subr.bf16.mxu0 %v478_v0  ;;  %434 = vmatpush3.bf16.msra.mxu1 %v467_v38 }
  0x11   :  { %v45_v25 = vmul.f32 0.125, %v44_v24  ;;  %v46_v26 = vmul.f32 %v36_v23, %v36_v23  ;;  %v49_v31 = vsub.f32 %v27_v4, %v36_v23  ;;  %435 = vmatprep.subr.bf16.mxu1 %v478_v0 }
  0x13   :  { %418 = vmatpush3.bf16.msra.mxu0 %v461_v17  ;;  %v47_v28 = vsub.f32 %v45_v25, %v46_v26 }
  0x14   :  { %419 = vmatprep.subr.bf16.mxu0 %v478_v0  ;;  %436 = vmatpush3.bf16.msra.mxu1 %v468_v39 }
  0x15   :  { %v48_v29 = vmax.f32 %v47_v28, 0.0  ;;  %437 = vmatprep.subr.bf16.mxu1 %v478_v0 }
  0x17   :  { %420 = vmatpush3.bf16.msra.mxu0 %v462_v22  ;;  %v50_v30 = vadd.f32 1e-05, %v48_v29 }
  0x18   :  { %421 = vmatprep.subr.bf16.mxu0 %v478_v0  ;;  %438 = vmatpush3.bf16.msra.mxu1 %v469_v40 }
  0x19   :  { %472 = vrsqrt.f32 %v50_v30  ;;  %439 = vmatprep.subr.bf16.mxu1 %v478_v0 }
  0x1b   :  { %422 = vmatpush3.bf16.msra.mxu0 %v463_v27 }
  0x1c   :  { %447 = vmatprep.subr.bf16.mxu0 %v478_v0  ;;  %440 = vmatpush3.bf16.msra.mxu1 %v470_v41  ;;  %v319_v41 = vld [vmem:[%s615_s5] sm:$0xf] }
  0x1d   :  { %441 = vmatprep.subr.bf16.mxu1 %v478_v0 }
  0x20   :  { %442 = vmatpush3.bf16.msra.mxu1 %v471_v42 }
  0x26   :  { %v473_v32 = vpop.eup %472 }
  0x27   :  { %v52_v33 = vmul.f32 %v473_v32, %v49_v31 }
  0x29   :  { %v53_v34 = vpack.c.bf16 %v52_v33, %v52_v33 }
  0x2b   :  { %424 = vmatmul.mubr.msk.bf16.vlgmr.msra.gmra.mxu0 %vm28_vm2, %v53_v34 }
  0x2c   :  { %449 = vmatprep.mubr.msk.bf16.mxu0 %vm479_vm1, %v478_v0 }
  0x85   :  { %v324_v42 = vpop.permute.xlu0 %323 }
  0xeb   :  { %v154_v44 = vpop.f32.mrf.mxu0 }
  0xec   :  { %v155_v45 = vadd.f32 %v372_v43, %v154_v44 }
  0xed   :  { %v425_v46 = vpop.f32.mrf.mxu0 }
  0xee   :  { %v160_v47 = vrot.slane %v155_v45, 4  ;;  %v167_v48 = vmul.f32 %v155_v45, %v155_v45 }
  0xef   :  { %v157_v49 = vpop.f32.mrf.mxu0 }
  0xf0   :  { %v161_v50 = vadd.f32 %v160_v47, %v155_v45  ;;  %v168_v51 = vrot.slane %v167_v48, 4 }
  0xf1   :  { %v426_v52 = vpop.f32.mrf.mxu0 }
  0xf2   :  { %v162_v53 = vrot.slane %v161_v50, 2  ;;  %v169_v54 = vadd.f32 %v168_v51, %v167_v48 }
  0xf4   :  { %v163_v55 = vadd.f32 %v162_v53, %v161_v50  ;;  %v170_v56 = vrot.slane %v169_v54, 2 }
  0xf6   :  { %v171_v57 = vadd.f32 %v170_v56, %v169_v54  ;;  %v164_v58 = vrot.slane %v163_v55, 1 }
  0xf8   :  { %v172_v59 = vrot.slane %v171_v57, 1  ;;  %v165_v60 = vadd.f32 %v164_v58, %v163_v55 }
  0xfa   :  { %v173_v61 = vadd.f32 %v172_v59, %v171_v57  ;;  %v166_v62 = vmul.f32 0.125, %v165_v60 }
  0xfc   :  { %v174_v63 = vmul.f32 0.125, %v173_v61  ;;  %v175_v0 = vmul.f32 %v166_v62, %v166_v62  ;;  %v178_v4 = vsub.f32 %v155_v45, %v166_v62 }
  0xfe   :  { %v176_v1 = vsub.f32 %v174_v63, %v175_v0 }
 0x100   :  { %v177_v2 = vmax.f32 %v176_v1, 0.0 }
 0x102   :  { %v179_v3 = vadd.f32 1e-05, %v177_v2 }
 0x104   :  { %474 = vrsqrt.f32 %v179_v3 }
 0x111   :  { %v475_v5 = vpop.eup %474 }
 0x112   :  { %v181_v6 = vmul.f32 %v475_v5, %v178_v4 }
 0x114   :  { %v182_v7 = vmax.f32 %v181_v6, 0.0 }
 0x116   :  { %v183_v8 = vpack.c.bf16 %v182_v7, %v182_v7 }
 0x118   :  { %444 = vmatmul.mubr.bf16.vlgmr.msra.gmra.mxu1 %v183_v8 }
 0x1d8   :  { %v289_v12 = vpop.f32.mrf.mxu1 }
 0x1d9   :  { %v290_v13 = vadd.f32 %v381_v11, %v289_v12 }
 0x1da   :  { %v445_v14 = vpop.f32.mrf.mxu1 }
 0x1db   :  { %v295_v15 = vrot.slane %v290_v13, 4  ;;  %v302_v16 = vmul.f32 %v290_v13, %v290_v13 }
 0x1dc   :  { %v292_v17 = vpop.f32.mrf.mxu1 }
 0x1dd   :  { %v296_v18 = vadd.f32 %v295_v15, %v290_v13  ;;  %v303_v19 = vrot.slane %v302_v16, 4 }
 0x1de   :  { %v446_v20 = vpop.f32.mrf.mxu1 }
 0x1df   :  { %v297_v21 = vrot.slane %v296_v18, 2  ;;  %v304_v22 = vadd.f32 %v303_v19, %v302_v16 }
 0x1e1   :  { %v298_v23 = vadd.f32 %v297_v21, %v296_v18  ;;  %v305_v24 = vrot.slane %v304_v22, 2 }
 0x1e3   :  { %v299_v25 = vrot.slane %v298_v23, 1  ;;  %v306_v26 = vadd.f32 %v305_v24, %v304_v22 }
 0x1e5   :  { %v300_v27 = vadd.f32 %v299_v25, %v298_v23  ;;  %v307_v28 = vrot.slane %v306_v26, 1 }
 0x1e7   :  { %v301_v29 = vmul.f32 0.125, %v300_v27  ;;  %v308_v30 = vadd.f32 %v307_v28, %v306_v26 }
 0x1e9   :  { %v309_v31 = vmul.f32 0.125, %v308_v30  ;;  %v310_v32 = vmul.f32 %v301_v29, %v301_v29  ;;  %v313_v36 = vsub.f32 %v290_v13, %v301_v29 }
 0x1eb   :  { %v311_v33 = vsub.f32 %v309_v31, %v310_v32 }
 0x1ed   :  { %v312_v34 = vmax.f32 %v311_v33, 0.0 }
 0x1ef   :  { %v314_v35 = vadd.f32 1e-05, %v312_v34 }
 0x1f1   :  { %476 = vrsqrt.f32 %v314_v35 }
 0x1fe   :  { %v477_v37 = vpop.eup %476 }
 0x1ff   :  { %v316_v38 = vmul.f32 %v477_v37, %v313_v36 }
 0x201   :  { %v317_v39 = vmax.f32 %v316_v38, 0.0 }
 0x203   :  { %v318_v40 = vpack.c.bf16 %v317_v39, %v317_v39 }
 0x205   :  { %448 = vmatpush3.bf16.xpose.msra.mxu0 %v318_v40 }
 0x20c   :  { %450 = vmatmul.mubr.bf16.vlgmr.msra.gmra.mxu0 %v319_v41 }
 0x2cc   :  { %v360_v43 = vpop.f32.mrf.mxu0 }
 0x2cd   :  { %v361_v44 = vadd.f32 %v360_v43, %v324_v42 }
 0x2ce   :  { %v451_v45 = vpop.f32.mrf.mxu0 }
 0x2cf   :  { %367 = vst.msk [vmem:[%s616_s7] sm:$0xff] %vm366_vm3, %v361_v44 }
 0x2d0   :  { %v363_v46 = vpop.f32.mrf.mxu0 }
 0x2d2   :  { %v452_v47 = vpop.f32.mrf.mxu0 }

</bundles_post_ra>
